<compile_context>
chip_gen: v5e
topology: v5e:2x2
jax: 0.10.0
libtpu: 0.0.40
codegen_flags: <defaults>
</compile_context>

<pallas_src>
from functools import partial

import numpy as np
import jax
import jax.numpy as jnp
from jax import lax
from jax.experimental import pallas as pl
from jax.experimental.pallas import tpu as pltpu

# ---------------- small synthetic config ----------------
B = 2            # batch of images processed per pallas_call (grid axis, "parallel")
IN_CH = 3
C = 8            # channels of the hooked activation layer
HT = WT = 16     # input spatial size
U = V = 8        # activation spatial size (conv stride 2)
MP = 4           # spatial after 2x2 maxpool
P = 2            # adaptive avgpool output
PP = P * P
NC = 10          # number of classes

CPP = C * PP     # 32  flattened pooled features
NCP = 128        # class dim padded to one full lane group (lane-dense logits output)
UV = U * V       # 64  flattened activation spatial
HW = HT * WT     # 256 flattened saliency spatial (lane-dense output, 2 x 128)


# ---------------- bilinear interpolation matrices (align_corners=False) ----------------
def bilinear_matrix(out_size, in_size):
    scale = in_size / out_size
    src = (np.arange(out_size) + 0.5) * scale - 0.5
    src = np.maximum(src, 0.0)                      # PyTorch clamps negative source idx to 0
    i0 = np.minimum(np.floor(src).astype(np.int64), in_size - 1)
    i1 = np.minimum(i0 + 1, in_size - 1)
    w1 = (src - i0).astype(np.float32)
    w0 = (1.0 - w1).astype(np.float32)
    m = np.zeros((out_size, in_size), np.float32)
    m[np.arange(out_size), i0] += w0
    m[np.arange(out_size), i1] += w1
    return m


LH_NP = bilinear_matrix(HT, U)                      # (HT, U)
LW_NP = bilinear_matrix(WT, V)                      # (WT, V)
LH = jnp.asarray(LH_NP)                             # for the pure-JAX reference
LWT = jnp.asarray(LW_NP.T)                          # (V, WT), for the pure-JAX reference
# Flattened bilinear upsample operator: (A @ kron(LH,LW)^T) == vec(LH @ A @ LW^T)
UPS_T = jnp.asarray(np.kron(LH_NP, LW_NP).T)        # (UV, HW) = (64, 256)

# Static ablation keep-mask (compile-time constant, VMEM-resident input):
#   row r (r<C) zeroes channel r's pooled PP-block, row C is the un-ablated baseline.
MASK_NP = np.ones((C + 1, CPP), np.float32)
for _r in range(C):
    MASK_NP[_r, _r * PP:(_r + 1) * PP] = 0.0
MASK = jnp.asarray(MASK_NP)                         # (C+1, CPP)


# ---------------- plain-JAX glue: conv stem + one-time head pooling ----------------
def conv_stem(x, cw, cb):
    y = lax.conv_general_dilated(
        x, cw, window_strides=(2, 2), padding=((1, 1), (1, 1)),
        dimension_numbers=("NCHW", "OIHW", "NCHW"))
    return jnp.maximum(y + cb[None, :, None, None], 0.0)     # (B, C, U, V)


def head_pool(act_chw):
    # MaxPool2d(2) then adaptive avgpool to (P, P), flattened like x.view(N, -1)
    a = act_chw.reshape(C, U // 2, 2, V // 2, 2).max(axis=(2, 4))        # (C, MP, MP)
    a = a.reshape(C, P, MP // P, P, MP // P).mean(axis=(2, 4))           # (C, P, P)
    return a.reshape(1, CPP)                                             # (1, C*PP)


# ---------------- fused Pallas kernel: head logits + ablations + alpha + saliency ----------------
def ablation_cam_kernel(cls_ref, pooled_ref, w_ref, b_ref, act_ref, ups_ref, mask_ref,
                        fused_ref, logits_ref):
    b = pl.program_id(0)

    # MXU push #1 — hoisted off the alpha critical path: bilinearly upsample ALL C
    # channels at once (M=C instead of a dependent M=1 matmul after alpha).
    act_up = jnp.dot(act_ref[0], ups_ref[...],
                     preferred_element_type=jnp.float32)                 # (C, HW)

    # MXU push #2 — baseline + all C ablated head logits as one masked matmul.
    # Rows 0..C-1: pooled features with channel r's pooled block zeroed
    #   (== headModel(activations with channel r ablated); per-channel max/avg pooling
    #   of an all-zero channel is zero, independent of sign — documented invariant).
    # Row C: the un-ablated baseline.
    p = pooled_ref[0]                                                    # (1, CPP)
    stacked = mask_ref[...] * p                                          # (C+1, CPP)
    all_logits = jnp.dot(stacked, w_ref[...],
                         preferred_element_type=jnp.float32) + b_ref[...]   # (C+1, NCP)

    logits = all_logits[C:C + 1, :]                                      # (1, NCP) baseline
    logits_ref[0] = logits                                               # lane-dense store

    # Class selection: explicit classid (cls_ref[b] >= 0) or argmax over NC real lanes.
    # Pure int32 path for the argmax (no float casts).
    lane = lax.broadcasted_iota(jnp.int32, (C + 1, NCP), 1)
    lane1 = lane[0:1, :]
    ml = jnp.where(lane1 < NC, logits, -jnp.inf)
    mx = jnp.max(ml)
    argmax_cls = jnp.min(jnp.where(ml == mx, lane1, NCP))
    sel = cls_ref[b]
    cls = jnp.where(sel >= 0, sel, argmax_cls)

    # Gather the class column: col[r, 0] = all_logits[r, cls]
    col = jnp.sum(jnp.where(lane == cls, all_logits, 0.0),
                  axis=1, keepdims=True)                                 # (C+1, 1)
    l_c = col[C:C + 1, :]                                                # (1, 1) baseline logit
    # NOTE: faithful to PyTorch — divides by the raw logit; blows up if l_c ~ 0.
    # EUP approx reciprocal instead of a VPU divide on the serial tail.
    alpha = (l_c - col[0:C, :]) * pl.reciprocal(l_c, approx=True)        # (C, 1)

    # Channel-weighted sum of the ALREADY upsampled channels (cheap VPU/XLU reduce).
    up = jnp.sum(act_up * alpha, axis=0, keepdims=True)                  # (1, HW)

    r = jnp.maximum(up, 0.0)                                             # F.relu
    rmx = jnp.max(r, axis=1, keepdims=True)                              # (1, 1)
    rmn = jnp.min(r, axis=1, keepdims=True)                              # (1, 1)
    rng = rmx - rmn
    # Guard the dead branch so the discarded path never produces a NaN.
    inv_rng = pl.reciprocal(jnp.where(rng != 0.0, rng, 1.0), approx=True)
    fused_ref[0] = jnp.where(rng != 0.0, (r - rmn) * inv_rng, r)


def run_ablation_cam_kernel(cls_arr, pooled, w_pad, b_pad, act_flat):
    nb = pooled.shape[0]
    return pl.pallas_call(
        ablation_cam_kernel,
        out_shape=(jax.ShapeDtypeStruct((nb, 1, HW), jnp.float32),     # fused saliency, flat
                   jax.ShapeDtypeStruct((nb, 1, NCP), jnp.float32)),   # padded logits
        grid_spec=pltpu.PrefetchScalarGridSpec(
            num_scalar_prefetch=1,                                      # cls selector (B,) int32
            grid=(nb,),
            in_specs=[
                pl.BlockSpec((1, 1, CPP), lambda b, cls: (b, 0, 0)),    # pooled     (per image)
                pl.BlockSpec((CPP, NCP), lambda b, cls: (0, 0)),        # w_pad      (resident)
                pl.BlockSpec((1, NCP), lambda b, cls: (0, 0)),          # b_pad      (resident)
                pl.BlockSpec((1, C, UV), lambda b, cls: (b, 0, 0)),     # act_flat   (per image)
                pl.BlockSpec((UV, HW), lambda b, cls: (0, 0)),          # ups_t      (resident)
                pl.BlockSpec((C + 1, CPP), lambda b, cls: (0, 0)),      # keep-mask  (resident)
            ],
            out_specs=(pl.BlockSpec((1, 1, HW), lambda b, cls: (b, 0, 0)),
                       pl.BlockSpec((1, 1, NCP), lambda b, cls: (b, 0, 0))),
        ),
        compiler_params=pltpu.CompilerParams(dimension_semantics=("parallel",)),
    )(cls_arr, pooled, w_pad, b_pad, act_flat, UPS_T, MASK)


# ---------------- AblationCAM forward (batched: one module forward per image) ----------------
@partial(jax.jit, static_argnames=("classid",))
def ablation_cam(x, params, classid=None):
    cw, cb, w_fc, b_fc = params
    nb = x.shape[0]
    act = conv_stem(x, cw, cb)                       # hooked activations (B, C, U, V)
    pooled = jax.vmap(head_pool)(act)                # (B, 1, C*PP)

    # lane-pad the classifier so all in-kernel stores/loads are lane-dense
    w_pad = jnp.zeros((CPP, NCP), jnp.float32).at[:, :NC].set(w_fc.T)
    b_pad = jnp.zeros((1, NCP), jnp.float32).at[:, :NC].set(b_fc)
    act_flat = act.reshape(nb, C, UV)                # (B, C, U*V)

    # TODO(synk): PyTorch's `if classid:` truthiness check (classid=0 behaves like None)
    # is Python-level control flow; classid is a static Python value here.
    sel = -1 if not classid else int(classid)
    cls_arr = jnp.full((nb,), sel, jnp.int32)

    fused, logits_pad = run_ablation_cam_kernel(cls_arr, pooled, w_pad, b_pad, act_flat)
    return fused.reshape(nb, HT, WT), logits_pad[:, 0, :NC]


# ---------------- pure-JAX reference replicating the PyTorch per-channel loop ----------------
def reference_ablation_cam(x, params, classid=None):
    cw, cb, w_fc, b_fc = params
    act = conv_stem(x, cw, cb)
    logits = (head_pool(act[0]) @ w_fc.T + b_fc)[0]
    cls = int(jnp.argmax(logits)) if not classid else int(classid)
    fused = jnp.zeros((HT, WT), jnp.float32)
    for i in range(C):
        up = LH @ act[0, i] @ LWT
        act_new = act.at[:, i].set(0.0)
        logits_new = (head_pool(act_new[0]) @ w_fc.T + b_fc)[0]
        a = (logits[cls] - logits_new[cls]) / logits[cls]
        fused = fused + a * up
    fused = jnp.maximum(fused, 0.0)
    mx, mn = fused.max(), fused.min()
    if bool(mx != mn):
        fused = (fused - mn) / (mx - mn)
    return fused, logits


if __name__ == "__main__":
    key = jax.random.PRNGKey(0)
    k_x, k_cw, k_cb, k_w, k_b = jax.random.split(key, 5)

    x = jax.random.normal(k_x, (B, IN_CH, HT, WT), jnp.float32)
    conv_w = 0.3 * jax.random.normal(k_cw, (C, IN_CH, 3, 3), jnp.float32)
    conv_b = 0.1 * jax.random.normal(k_cb, (C,), jnp.float32)
    fc_w = 0.3 * jax.random.normal(k_w, (NC, CPP), jnp.float32)
    fc_b = 0.1 * jax.random.normal(k_b, (NC,), jnp.float32)
    params = (conv_w, conv_b, fc_w, fc_b)

    fused_maps, logits = ablation_cam(x, params, classid=None)
    jax.block_until_ready(fused_maps)
    jax.block_until_ready(logits)
    assert fused_maps.shape == (B, HT, WT) and logits.shape == (B, NC)

    for bi in range(B):
        ref_map, ref_logits = reference_ablation_cam(x[bi:bi + 1], params, classid=None)
        assert np.allclose(np.asarray(logits[bi]), np.asarray(ref_logits),
                           rtol=1e-3, atol=1e-4)
        assert np.allclose(np.asarray(fused_maps[bi]), np.asarray(ref_map),
                           rtol=1e-2, atol=1e-3)

    print("KERNEL_OK")
</pallas_src>

<mosaic_0001>
module attributes {stable_mosaic.version = 11 : i64} {
  func.func @ablation_cam_kernel(%arg0: i32, %arg1: memref<2xi32, #tpu.memory_space<smem>>, %arg2: memref<1x1x32xf32, #tpu.memory_space<vmem>>, %arg3: memref<32x128xf32, #tpu.memory_space<vmem>>, %arg4: memref<1x128xf32, #tpu.memory_space<vmem>>, %arg5: memref<1x8x64xf32, #tpu.memory_space<vmem>>, %arg6: memref<64x256xf32, #tpu.memory_space<vmem>>, %arg7: memref<9x32xf32, #tpu.memory_space<vmem>>, %arg8: memref<1x1x256xf32, #tpu.memory_space<vmem>>, %arg9: memref<1x1x128xf32, #tpu.memory_space<vmem>>) attributes {dimension_semantics = [#tpu.dimension_semantics<parallel>], iteration_bounds = array<i64: 2>, scalar_prefetch = 1 : i64, scratch_operands = 0 : i64, tpu.core_type = #tpu.core_type<tc>, window_params = [{transform_indices = @transform_0, window_bounds = array<i64: 1, 1, 32>}, {pipeline_mode = #tpu.pipeline_mode<synchronous>, transform_indices = @transform_1, window_bounds = array<i64: 32, 128>}, {pipeline_mode = #tpu.pipeline_mode<synchronous>, transform_indices = @transform_2, window_bounds = array<i64: 1, 128>}, {transform_indices = @transform_3, window_bounds = array<i64: 1, 8, 64>}, {pipeline_mode = #tpu.pipeline_mode<synchronous>, transform_indices = @transform_4, window_bounds = array<i64: 64, 256>}, {pipeline_mode = #tpu.pipeline_mode<synchronous>, transform_indices = @transform_5, window_bounds = array<i64: 9, 32>}, {transform_indices = @transform_6, window_bounds = array<i64: 1, 1, 256>}, {transform_indices = @transform_7, window_bounds = array<i64: 1, 1, 128>}]} {
    %c0 = arith.constant 0 : index
    %c0_0 = arith.constant 0 : index
    %c0_1 = arith.constant 0 : index
    %0 = vector.load %arg5[%c0, %c0_0, %c0_1] : memref<1x8x64xf32, #tpu.memory_space<vmem>>, vector<1x8x64xf32>
    %1 = vector.shape_cast %0 : vector<1x8x64xf32> to vector<8x64xf32>
    %c0_2 = arith.constant 0 : index
    %c0_3 = arith.constant 0 : index
    %2 = vector.load %arg6[%c0_2, %c0_3] : memref<64x256xf32, #tpu.memory_space<vmem>>, vector<64x256xf32>
    %cst = arith.constant dense<0.000000e+00> : vector<8x256xf32>
    %3 = tpu.matmul %1, %2, %cst {dimension_numbers = #tpu.dot_dimension_numbers<[1], [0], [0], [1], [0, 0, 1, 1], [], []>} : vector<8x64xf32>, vector<64x256xf32>, vector<8x256xf32> -> vector<8x256xf32>
    %c0_4 = arith.constant 0 : index
    %c0_5 = arith.constant 0 : index
    %c0_6 = arith.constant 0 : index
    %4 = vector.load %arg2[%c0_4, %c0_5, %c0_6] : memref<1x1x32xf32, #tpu.memory_space<vmem>>, vector<1x1x32xf32>
    %5 = vector.shape_cast %4 : vector<1x1x32xf32> to vector<1x32xf32>
    %c0_7 = arith.constant 0 : index
    %c0_8 = arith.constant 0 : index
    %6 = vector.load %arg7[%c0_7, %c0_8] : memref<9x32xf32, #tpu.memory_space<vmem>>, vector<9x32xf32>
    %7 = vector.broadcast %5 : vector<1x32xf32> to vector<9x32xf32>
    %8 = arith.mulf %6, %7 : vector<9x32xf32>
    %c0_9 = arith.constant 0 : index
    %c0_10 = arith.constant 0 : index
    %9 = vector.load %arg3[%c0_9, %c0_10] : memref<32x128xf32, #tpu.memory_space<vmem>>, vector<32x128xf32>
    %cst_11 = arith.constant dense<0.000000e+00> : vector<9x128xf32>
    %10 = tpu.matmul %8, %9, %cst_11 {dimension_numbers = #tpu.dot_dimension_numbers<[1], [0], [0], [1], [0, 0, 1, 1], [], []>} : vector<9x32xf32>, vector<32x128xf32>, vector<9x128xf32> -> vector<9x128xf32>
    %c0_12 = arith.constant 0 : index
    %c0_13 = arith.constant 0 : index
    %11 = vector.load %arg4[%c0_12, %c0_13] : memref<1x128xf32, #tpu.memory_space<vmem>>, vector<1x128xf32>
    %12 = vector.broadcast %11 : vector<1x128xf32> to vector<9x128xf32>
    %13 = arith.addf %10, %12 : vector<9x128xf32>
    %14 = vector.extract_strided_slice %13 {offsets = [8, 0], sizes = [1, 128], strides = [1, 1]} : vector<9x128xf32> to vector<1x128xf32>
    %c0_14 = arith.constant 0 : index
    %c0_15 = arith.constant 0 : index
    %c0_16 = arith.constant 0 : index
    %15 = vector.load %arg9[%c0_14, %c0_15, %c0_16] : memref<1x1x128xf32, #tpu.memory_space<vmem>>, vector<1x1x128xf32>
    %16 = vector.shape_cast %15 : vector<1x1x128xf32> to vector<1x128xf32>
    %17 = vector.shape_cast %14 : vector<1x128xf32> to vector<1x1x128xf32>
    tpu.vector_store %arg9[%c0_14, %c0_15, %c0_16], %17 {strides = array<i32>} : memref<1x1x128xf32, #tpu.memory_space<vmem>>, vector<1x1x128xf32>,
    %18 = tpu.iota {dimensions = array<i32: 1>} : vector<9x128xi32>
    %19 = vector.extract_strided_slice %18 {offsets = [0, 0], sizes = [1, 128], strides = [1, 1]} : vector<9x128xi32> to vector<1x128xi32>
    %c10_i32 = arith.constant 10 : i32
    %20 = vector.broadcast %c10_i32 : i32 to vector<1x128xi32>
    %21 = arith.cmpi slt, %19, %20 : vector<1x128xi32>
    %cst_17 = arith.constant 0xFF800000 : f32
    %22 = vector.broadcast %cst_17 : f32 to vector<1x128xf32>
    %23 = arith.select %21, %14, %22 : vector<1x128xi1>, vector<1x128xf32>
    %24 = vector.shape_cast %23 : vector<1x128xf32> to vector<1x1x128xf32>
    %cst_18 = arith.constant dense<0xFF800000> : vector<1xf32>
    %25 = vector.multi_reduction <maximumf>, %24, %cst_18 [1, 2] : vector<1x1x128xf32> to vector<1xf32>
    %26 = vector.shape_cast %25 : vector<1xf32> to vector<1x1x1xf32>
    %27 = vector.extract %26[0, 0, 0] : f32 from vector<1x1x1xf32>
    %28 = vector.broadcast %27 : f32 to vector<1x128xf32>
    %29 = arith.cmpf oeq, %23, %28 : vector<1x128xf32>
    %c128_i32 = arith.constant 128 : i32
    %30 = vector.broadcast %c128_i32 : i32 to vector<1x128xi32>
    %31 = arith.select %29, %19, %30 : vector<1x128xi1>, vector<1x128xi32>
    %32 = vector.shape_cast %31 : vector<1x128xi32> to vector<1x1x128xi32>
    %cst_19 = arith.constant dense<2147483647> : vector<1xi32>
    %33 = vector.multi_reduction <minsi>, %32, %cst_19 [1, 2] : vector<1x1x128xi32> to vector<1xi32>
    %34 = vector.shape_cast %33 : vector<1xi32> to vector<1x1x1xi32>
    %35 = vector.extract %34[0, 0, 0] : i32 from vector<1x1x1xi32>
    %36 = arith.index_cast %arg0 : i32 to index
    %37 = memref.load %arg1[%36] : memref<2xi32, #tpu.memory_space<smem>>
    %c0_i32 = arith.constant 0 : i32
    %38 = arith.cmpi sge, %37, %c0_i32 : i32
    %39 = arith.select %38, %37, %35 : i32
    %40 = vector.broadcast %39 : i32 to vector<9x128xi32>
    %41 = arith.cmpi eq, %18, %40 : vector<9x128xi32>
    %cst_20 = arith.constant 0.000000e+00 : f32
    %42 = vector.broadcast %cst_20 : f32 to vector<9x128xf32>
    %43 = arith.select %41, %13, %42 : vector<9x128xi1>, vector<9x128xf32>
    %cst_21 = arith.constant dense<0.000000e+00> : vector<9xf32>
    %44 = vector.multi_reduction <add>, %43, %cst_21 [1] : vector<9x128xf32> to vector<9xf32>
    %45 = vector.shape_cast %44 : vector<9xf32> to vector<9x1xf32>
    %46 = vector.extract_strided_slice %45 {offsets = [8, 0], sizes = [1, 1], strides = [1, 1]} : vector<9x1xf32> to vector<1x1xf32>
    %47 = vector.extract_strided_slice %45 {offsets = [0, 0], sizes = [8, 1], strides = [1, 1]} : vector<9x1xf32> to vector<8x1xf32>
    %48 = vector.broadcast %46 : vector<1x1xf32> to vector<8x1xf32>
    %49 = arith.subf %48, %47 : vector<8x1xf32>
    %50 = tpu.reciprocal %46 {approx = true} : vector<1x1xf32> -> vector<1x1xf32>
    %51 = vector.broadcast %50 : vector<1x1xf32> to vector<8x1xf32>
    %52 = arith.mulf %49, %51 : vector<8x1xf32>
    %53 = vector.broadcast %52 : vector<8x1xf32> to vector<8x256xf32>
    %54 = arith.mulf %3, %53 : vector<8x256xf32>
    %cst_22 = arith.constant dense<0.000000e+00> : vector<256xf32>
    %55 = vector.multi_reduction <add>, %54, %cst_22 [0] : vector<8x256xf32> to vector<256xf32>
    %56 = vector.shape_cast %55 : vector<256xf32> to vector<1x256xf32>
    %cst_23 = arith.constant 0.000000e+00 : f32
    %57 = vector.broadcast %cst_23 : f32 to vector<1x256xf32>
    %58 = arith.maximumf %56, %57 : vector<1x256xf32>
    %cst_24 = arith.constant dense<0xFF800000> : vector<1xf32>
    %59 = vector.multi_reduction <maximumf>, %58, %cst_24 [1] : vector<1x256xf32> to vector<1xf32>
    %60 = vector.shape_cast %59 : vector<1xf32> to vector<1x1xf32>
    %cst_25 = arith.constant dense<0x7F800000> : vector<1xf32>
    %61 = vector.multi_reduction <minimumf>, %58, %cst_25 [1] : vector<1x256xf32> to vector<1xf32>
    %62 = vector.shape_cast %61 : vector<1xf32> to vector<1x1xf32>
    %63 = arith.subf %60, %62 : vector<1x1xf32>
    %cst_26 = arith.constant 0.000000e+00 : f32
    %64 = vector.broadcast %cst_26 : f32 to vector<1x1xf32>
    %65 = arith.cmpf one, %63, %64 : vector<1x1xf32>
    %cst_27 = arith.constant 1.000000e+00 : f32
    %66 = vector.broadcast %cst_27 : f32 to vector<1x1xf32>
    %67 = arith.select %65, %63, %66 : vector<1x1xi1>, vector<1x1xf32>
    %68 = tpu.reciprocal %67 {approx = true} : vector<1x1xf32> -> vector<1x1xf32>
    %cst_28 = arith.constant 0.000000e+00 : f32
    %69 = vector.broadcast %cst_28 : f32 to vector<1x1xf32>
    %70 = arith.cmpf one, %63, %69 : vector<1x1xf32>
    %71 = vector.broadcast %62 : vector<1x1xf32> to vector<1x256xf32>
    %72 = arith.subf %58, %71 : vector<1x256xf32>
    %73 = vector.broadcast %68 : vector<1x1xf32> to vector<1x256xf32>
    %74 = arith.mulf %72, %73 : vector<1x256xf32>
    %75 = vector.shape_cast %70 : vector<1x1xi1> to vector<1x1xi1>
    %76 = vector.broadcast %75 : vector<1x1xi1> to vector<1x256xi1>
    %77 = arith.select %76, %74, %58 : vector<1x256xi1>, vector<1x256xf32>
    %c0_29 = arith.constant 0 : index
    %c0_30 = arith.constant 0 : index
    %c0_31 = arith.constant 0 : index
    %78 = vector.load %arg8[%c0_29, %c0_30, %c0_31] : memref<1x1x256xf32, #tpu.memory_space<vmem>>, vector<1x1x256xf32>
    %79 = vector.shape_cast %78 : vector<1x1x256xf32> to vector<1x256xf32>
    %80 = vector.shape_cast %77 : vector<1x256xf32> to vector<1x1x256xf32>
    tpu.vector_store %arg8[%c0_29, %c0_30, %c0_31], %80 {strides = array<i32>} : memref<1x1x256xf32, #tpu.memory_space<vmem>>, vector<1x1x256xf32>,
    return
  }
  func.func @transform_0(%arg0: i32, %arg1: memref<2xi32, #tpu.memory_space<smem>>) -> (i32, i32, i32) {
    %c0_i32 = arith.constant 0 : i32
    %c0_i32_0 = arith.constant 0 : i32
    %c0_i32_1 = arith.constant 0 : i32
    return %arg0, %c0_i32, %c0_i32_0 : i32, i32, i32
  }
  func.func @transform_1(%arg0: i32, %arg1: memref<2xi32, #tpu.memory_space<smem>>) -> (i32, i32) {
    %c0_i32 = arith.constant 0 : i32
    %c0_i32_0 = arith.constant 0 : i32
    %c0_i32_1 = arith.constant 0 : i32
    return %c0_i32, %c0_i32_0 : i32, i32
  }
  func.func @transform_2(%arg0: i32, %arg1: memref<2xi32, #tpu.memory_space<smem>>) -> (i32, i32) {
    %c0_i32 = arith.constant 0 : i32
    %c0_i32_0 = arith.constant 0 : i32
    %c0_i32_1 = arith.constant 0 : i32
    return %c0_i32, %c0_i32_0 : i32, i32
  }
  func.func @transform_3(%arg0: i32, %arg1: memref<2xi32, #tpu.memory_space<smem>>) -> (i32, i32, i32) {
    %c0_i32 = arith.constant 0 : i32
    %c0_i32_0 = arith.constant 0 : i32
    %c0_i32_1 = arith.constant 0 : i32
    return %arg0, %c0_i32, %c0_i32_0 : i32, i32, i32
  }
  func.func @transform_4(%arg0: i32, %arg1: memref<2xi32, #tpu.memory_space<smem>>) -> (i32, i32) {
    %c0_i32 = arith.constant 0 : i32
    %c0_i32_0 = arith.constant 0 : i32
    %c0_i32_1 = arith.constant 0 : i32
    return %c0_i32, %c0_i32_0 : i32, i32
  }
  func.func @transform_5(%arg0: i32, %arg1: memref<2xi32, #tpu.memory_space<smem>>) -> (i32, i32) {
    %c0_i32 = arith.constant 0 : i32
    %c0_i32_0 = arith.constant 0 : i32
    %c0_i32_1 = arith.constant 0 : i32
    return %c0_i32, %c0_i32_0 : i32, i32
  }
  func.func @transform_6(%arg0: i32, %arg1: memref<2xi32, #tpu.memory_space<smem>>) -> (i32, i32, i32) {
    %c0_i32 = arith.constant 0 : i32
    %c0_i32_0 = arith.constant 0 : i32
    %c0_i32_1 = arith.constant 0 : i32
    return %arg0, %c0_i32, %c0_i32_0 : i32, i32, i32
  }
  func.func @transform_7(%arg0: i32, %arg1: memref<2xi32, #tpu.memory_space<smem>>) -> (i32, i32, i32) {
    %c0_i32 = arith.constant 0 : i32
    %c0_i32_0 = arith.constant 0 : i32
    %c0_i32_1 = arith.constant 0 : i32
    return %arg0, %c0_i32, %c0_i32_0 : i32, i32, i32
  }
}

</mosaic_0001>

<bundles_post_ra>
// kernel: ablation_cam.1
= control target key start
LH: loop header
LB: loop body
LE: loop exit
PB: predicated region body
PF: predicated region fallthrough
CT: control target
= control target key end

     0   :  { %s767_s30 = smov [#allocation3]   ;;  %s1009_s0 = inlined_call_operand.vmem [shape: s32[2], index: 0, kind: input, shape index: {}]   ;;  %s1010_s1 = inlined_call_operand.vmem [shape: f32[2,1,32], index: 1, kind: input, shape index: {}]   ;;  %s1011_s2 = inlined_call_operand.vmem [shape: f32[32,128], index: 2, kind: input, shape index: {}]   ;;  %s1012_s3 = inlined_call_operand.vmem [shape: f32[1,128], index: 3, kind: input, shape index: {}]   ;;  %s1013_s4 = inlined_call_operand.vmem [shape: f32[2,8,64], index: 4, kind: input, shape index: {}]   ;;  %s1014_s5 = inlined_call_operand.vmem [shape: f32[64,256], index: 5, kind: input, shape index: {}]   ;;  %s1015_s6 = inlined_call_operand.vmem [shape: f32[9,32], index: 6, kind: input, shape index: {}]   ;;  %s1016_s7 = inlined_call_operand.vmem [shape: f32[2,1,256], index: 7, kind: output, shape index: {0}]   ;;  %s1017_s8 = inlined_call_operand.hbm [shape: f32[2,1,128], index: 8, kind: output, shape index: {1}]  }
   0x1   :  { %1018 = sst [smem:[#allocation8_spill]] %s1010_s1  ;;  %s15_s29 = sshll.u32 %s1009_s0, 4  ;;  %s16_s29 = int_to_ptr.vmem [resolvable:$true] %s15_s29 }
   0x2   :  { %18 = dma.vmem_to_smem %s16_s29, 16, %s767_s30, [#allocation2] }
   0x3   :  { %745 = dma.done.wait [#allocation2], 16 }
   0x4   :  { %746 = vsyncadd [#allocation2], 4294967280 }
   0x5   :  { %21 = sfence }
   0x6   :  { %22 = vsyncpa [#allocation5], 0 }
   0x7   :  { %24 = vsyncpa [#allocation5 + $0x1], 0  ;;  %s816_s9 = smov 0   ;;  %s818_s10 = smov 0  }
   0x8   :  { %s820_s11 = smov 0   ;;  %s822_s12 = smov 0  }
   0x9 LB: > { %s837_s0 = sadd.s32 4294967295, %s765_s12   ;;  %s627_s13 = sadd.s32 4294967294, %s765_s12   ;;  %s765_s12 = sphi %s822_s12, %s1025_s12   ;;  %s761_s11 = sphi %s820_s11, %s1024_s11   ;;  %s757_s10 = sphi %s818_s10, %s1023_s10   ;;  %s753_s9 = sphi %s816_s9, %s1022_s9  }
   0xa   : > { %s841_s14 = sadd.s32 1, %s765_s12   ;;  %s199_s15 = sadd.s32 1, %s761_s11 }
   0xb   : > { %s196_s16 = ssub.s32 %s765_s12, %s841_s14  ;;  %p209_p0 = scmp.ne.s32.totalorder %s761_s11, %s757_s10 }
   0xc   : > { %p197_p1 = scmp.eq.s32.totalorder %s196_s16, 0  ;;  %p210_p2 = scmp.eq.s32.totalorder %s837_s0, 1 }
   0xd   : > { %p215_p3 = scmp.ne.s32.totalorder %s757_s10, %s753_s9  ;;  %p216_p4 = scmp.eq.s32.totalorder %s627_s13, 1 }
   0xe   : > { %s852_s17 = scalar_select %p197_p1, %s761_s11, %s199_s15  }
   0xf   : > { %p854_p5 = por %p210_p2, %p209_p0  ;;  %p858_p6 = por %p216_p4, %p215_p3 }
  0x10   : > { %p630_p7 = scmp.ge.s32.totalorder %s765_s12, 1  ;;  %p259_p8 = scmp.lt.s32.totalorder %s765_s12, 3 }
  0x12   : > { %p260_p9 = pnand %p630_p7, %p259_p8 }
  0x13   : > { %p296_p10 = scmp.lt.s32.totalorder (!%p260_p9), %s837_s0, 1  ;;  %s1021_s1 = sld [smem:[#allocation8_spill]] (!%p260_p9) }
  0x14   : > { %263 = sbr.rel (%p260_p9) target bundleno = 947 (0x3b3), region = 44  ;;  %s294_s24 = sand.u32 (!%p260_p9), 1, %s757_s10  }
  0x15   : > { %s905_s25 = scalar_lea.vmem (!%p260_p9), [#allocation4], %s294_s24  ;;  %s458_s15 = sld [smem:[#allocation3 + %s837_s0]] (!%p260_p9) }
  0x16   : > { %s535_s21 = scalar_lea.hbm (!%p260_p9), %s1017_s8, %s837_s0  ;;  %s537_s22 = sshll.u32 (!%p260_p9), %s905_s25, 4  ;;  %s538_s22 = int_to_ptr.vmem [resolvable:$true] %s537_s22 }
  0x19   : > { %v379_v0 = vld [vmem:[%s1011_s2 + $0x18] sm:$0xff]  ;;  %v378_v1 = vld [vmem:[%s1011_s2 + $0x10] sm:$0xff]  ;;  %v377_v2 = vld [vmem:[%s1011_s2 + $0x8] sm:$0xff]  ;;  %s875_s26 = scalar_select %p296_p10, %s837_s0, 1  ;;  %vm384_vm0 = vcmask 261120   ;;  %v415_v11 = vlaneseq  ;;  %vm419_vm2 = vcmask 1040384  }
  0x1a   : > { %403 = vmatpush.msra.mxu2 %v379_v0  ;;  %v376_v3 = vld [vmem:[%s1011_s2] sm:$0xff]  ;;  %v370_v7 = vld [vmem:[%s1015_s6 + $0x8] sm:$0x1]  ;;  %v322_v34 = vld [vmem:[%s1014_s5 + $0x70] sm:$0xff]  ;;  %vm324_vm8 = vcmask 523264  }
  0x1b   : > { %s298_s13 = scalar_lea.vmem %s1021_s1, %s875_s26  ;;  %v369_v4 = vld [vmem:[%s1015_s6] sm:$0xff]  ;;  %v896_v13 = vand.u32 127, %v415_v11  ;;  %v323_v35 = vld [vmem:[%s1014_s5 + $0x78] sm:$0xff]  ;;  %336 = vmatpush.msra.mxu0 %v322_v34  ;;  %v321_v37 = vld [vmem:[%s1014_s5 + $0x68] sm:$0xff]  ;;  %s631_s30 = sshll.u32 %s875_s26, 3 }
  0x1c   : > { %404 = vmatpush.msra.mxu2 %v378_v1  ;;  %v683_v5 = vld [vmem:[%s298_s13] ss:$0 sm:$0xff]  ;;  %356 = vmatpush.msra.mxu1 %v323_v35  ;;  %v318_v38 = vld [vmem:[%s1014_s5 + $0x50] sm:$0xff]  ;;  %v319_v39 = vld [vmem:[%s1014_s5 + $0x58] sm:$0xff]  ;;  %s302_s23 = scalar_lea.vmem %s1013_s4, %s631_s30  ;;  %p459_p11 = scmp.ge.s32.totalorder %s458_s15, 0 }
  0x1d   : > { %v374_v6 = vmul.f32 %v683_v5, %v369_v4  ;;  %v375_v8 = vmul.f32 %v683_v5, %v370_v7  ;;  %v684_v9 = vld [vmem:[%s1012_s3] ss:$0 sm:$0xff]  ;;  %vm417_vm1 = vcmp.lt.s32.totalorder %v896_v13, 10  ;;  %v317_v41 = vld [vmem:[%s1014_s5 + $0x48] sm:$0xff]  ;;  %v314_v53 = vld [vmem:[%s1014_s5 + $0x30] sm:$0xff] }
  0x1e   : > { %405 = vmatpush.msra.mxu2 %v377_v2  ;;  %v320_v36 = vld [vmem:[%s1014_s5 + $0x60] sm:$0xff]  ;;  %357 = vmatpush.msra.mxu1 %v321_v37  ;;  %v315_v54 = vld [vmem:[%s1014_s5 + $0x38] sm:$0xff]  ;;  %v313_v56 = vld [vmem:[%s1014_s5 + $0x28] sm:$0xff] }
  0x1f   : > { %337 = vmatpush.msra.mxu0 %v320_v36  ;;  %v316_v40 = vld [vmem:[%s1014_s5 + $0x40] sm:$0xff]  ;;  %v310_v57 = vld [vmem:[%s1014_s5 + $0x10] sm:$0xff]  ;;  %v311_v58 = vld [vmem:[%s1014_s5 + $0x18] sm:$0xff] }
  0x20   : > { %406 = vmatpush.msra.mxu2 %v376_v3  ;;  %358 = vmatpush.msra.mxu1 %v319_v39  ;;  %v312_v55 = vld [vmem:[%s1014_s5 + $0x20] sm:$0xff]  ;;  %v309_v60 = vld [vmem:[%s1014_s5 + $0x8] sm:$0xff] }
  0x21   : > { %635 = vmatmul.msk.f32.vlgmr.msra.gmra.mxu2 %vm384_vm0, %v374_v6  ;;  %338 = vmatpush.msra.mxu0 %v318_v38  ;;  %v308_v59 = vld [vmem:[%s1014_s5] sm:$0xff] }
  0x22   : > { %359 = vmatpush.msra.mxu1 %v317_v41  ;;  %v307_v61 = vld [vmem:[%s302_s23] sm:$0xff]  ;;  %s539_s23 = sshll.u32 %s535_s21, 4  ;;  %s540_s23 = int_to_ptr.hbm [resolvable:$true] %s539_s23 }
  0x23   : > { %339 = vmatpush.msra.mxu0 %v316_v40  ;;  %s715_s28 = sshra.s32 %s540_s23, 4  ;;  %s716_s28 = int_to_ptr.hbm [resolvable:$true] %s715_s28 }
  0x24   : > { %360 = vmatpush.msra.mxu1 %v315_v54  ;;  %s717_s29 = scalar_lea.hbm %s716_s28, 1  ;;  %p722_p1 = scmp.lt.s32.totalorder %s716_s28, %s1017_s8 }
  0x25   : > { %340 = vmatpush.msra.mxu0 %v314_v53  ;;  %p718_p12 = scmp.ne.s32.totalorder %s716_s28, %s717_s29 }
  0x26   : > { %361 = vmatpush.msra.mxu1 %v313_v56 }
  0x27   : > { %341 = vmatpush.msra.mxu0 %v312_v55  ;;  %p719_p13 = pnand %p718_p12, %p854_p5 }
  0x28   : > { %362 = vmatpush.msra.mxu1 %v311_v58 }
  0x29   : > { %636 = vmatmul.msk.f32.gmra.mxu2 %vm384_vm0, %v375_v8  ;;  %342 = vmatpush.msra.mxu0 %v310_v57  ;;  %p720_p0 = pneg %p719_p13 }
  0x2a   : > { %363 = vmatpush.msra.mxu1 %v309_v60 }
  0x2b   : > { %343 = vmatpush.msra.mxu0 %v308_v59  ;;  %634 = vmatmul.msk.f32.vlgmr.msra.gmra.mxu1 %vm324_vm8, %v307_v61 }
  0x2c   : > { %633 = vmatmul.msk.f32.vlgmr.msra.gmra.mxu0 %vm324_vm8, %v307_v61 }
  0xa4   : > { %v408_v10 = vpop.f32.mrf.mxu2 }
  0xa5   : > { %v893_v12 = vadd.f32 %v684_v9, %v408_v10 }
  0xa9   : > { %v345_v8 = vpop.f32.mrf.mxu0 }
  0xac   : > { %v411_v14 = vpop.f32.mrf.mxu2 }
  0xad   : > { %v900_v15 = vadd.f32 %v684_v9, %v411_v14  ;;  %v365_v9 = vpop.f32.mrf.mxu1 }
  0xaf   : > { %v418_v16 = vsel %vm417_vm1, %v900_v15, -inf  ;;  %414 = vst [vmem:[%s905_s25] sm:$0x1] %v900_v15 }
  0xb0   : > { %v420_v17 = vsel %vm419_vm2, %v418_v16, -inf }
  0xb1   : > { %421 = vmax.xlane.f32.xlu0 %v420_v17 }
 0x124   : > { %v422_v18 = vpop.xlane.xlu0 %421 }
 0x125   : > { %v423_v19 = vrot.slane %v422_v18, 4 }
 0x127   : > { %v424_v20 = vmax.f32 %v422_v18, %v423_v19 }
 0x129   : > { %v425_v21 = vrot.slane %v424_v20, 2 }
 0x12b   : > { %v426_v22 = vmax.f32 %v424_v20, %v425_v21 }
 0x12d   : > { %v427_v23 = vrot.slane %v426_v22, 1 }
 0x12f   : > { %v428_v24 = vmax.f32 %v426_v22, %v427_v23 }
 0x131   : > { %639 = vpush %v428_v24 }
 0x162   : > { %s640_s27 = spop %639 }
 0x163   : > { %v430_v25 = vstv %s640_s27  ;;  %s524_s27 = scalar_lea.sflag [#allocation5], %s294_s24 }
 0x164   : > { %vm431_vm3 = vcmp.eq.f32.partialorder %v418_v16, %v430_v25 }
 0x165   : > { %v432_v26 = vsel %vm431_vm3, %v896_v13, 128 }
 0x166   : > { %v433_v27 = vsel %vm419_vm2, %v432_v26, 2147483647 }
 0x167   : > { %v435_v28 = vshra.s32 %v433_v27, 16  ;;  %v434_v30 = vand.u32 65535, %v433_v27 }
 0x169   : > { %v437_v29 = vcvt.s32.f32 %v435_v28  ;;  %v436_v32 = vcvt.s32.f32 %v434_v30 }
 0x16b   : > { %438 = vmin.xlane.f32.xlu0 %v437_v29 }
 0x1de   : > { %v439_v31 = vpop.xlane.xlu0 %438 }
 0x1df   : > { %vm440_vm4 = vcmp.eq.f32.partialorder %v437_v29, %v439_v31  ;;  %v445_v42 = vcvt.f32.s32 %v439_v31 }
 0x1e0   : > { %v441_v33 = vsel %vm440_vm4, %v436_v32, inf }
 0x1e1   : > { %442 = vmin.xlane.f32.xlu1 %v441_v33  ;;  %v446_v44 = vshll.u32 %v445_v42, 16 }
 0x254   : > { %v443_v43 = vpop.xlane.xlu1 %442 }
 0x255   : > { %v444_v45 = vcvt.f32.s32 %v443_v43 }
 0x257   : > { %v447_v46 = vadd.s32 %v446_v44, %v444_v45 }
 0x259   : > { %v448_v47 = vrot.slane %v447_v46, 4 }
 0x25b   : > { %vm449_vm5 = vcmp.lt.s32.totalorder %v447_v46, %v448_v47 }
 0x25c   : > { %v450_v48 = vsel %vm449_vm5, %v447_v46, %v448_v47 }
 0x25d   : > { %v451_v49 = vrot.slane %v450_v48, 2 }
 0x25f   : > { %vm452_vm6 = vcmp.lt.s32.totalorder %v450_v48, %v451_v49 }
 0x260   : > { %v453_v50 = vsel %vm452_vm6, %v450_v48, %v451_v49 }
 0x261   : > { %v454_v51 = vrot.slane %v453_v50, 1 }
 0x263   : > { %vm455_vm7 = vcmp.lt.s32.totalorder %v453_v50, %v454_v51 }
 0x264   : > { %v456_v52 = vsel %vm455_vm7, %v453_v50, %v454_v51 }
 0x265   : > { %641 = vpush %v456_v52 }
 0x296   : > { %s642_s16 = spop %641 }
 0x297   : > { %s1027_s15 = smov (!%p459_p11, %s458_s15), %s642_s16  ;;  %s721_s16 = scalar_lea.hbm %s1017_s8, 2 }
 0x298   : > { %v461_v62 = vstv %s1027_s15  ;;  %p723_p2 = scmp.lt.s32.totalorder %s721_s16, %s717_s29 }
 0x299   : > { %vm462_vm9 = vcmp.eq.s32.totalorder %v896_v13, %v461_v62 }
 0x29a   : > { %v463_v63 = vsel %vm462_vm9, %v893_v12, 0.0  ;;  %v464_v0 = vsel %vm462_vm9, %v900_v15, 0.0  ;;  %p724_p3 = por %p723_p2, %p722_p1 }
 0x29b   : > { %465 = vadd.xlane.f32.xlu2 %v463_v63  ;;  %v467_v1 = vsel %vm419_vm2, %v464_v0, 0.0 }
 0x29c   : > { %468 = vadd.xlane.f32.xlu1 %v467_v1  ;;  %p725_p4 = pnand %p724_p3, %p720_p0 }
 0x30e   : > { %v466_v5 = vpop.xlane.xlu2 %465 }
 0x30f   : > { %v469_v2 = vpop.xlane.xlu1 %468 }
 0x310   : > { %685 = vrcp.f32 %v469_v2  ;;  %v470_v3 = vperm.slane %v469_v2, 0 }
 0x312   : > { %v471_v6 = vsub.f32 %v470_v3, %v466_v5 }
 0x316   : > { %v686_v4 = vpop.eup %685 }
 0x317   : > { %v473_v7 = vperm.slane %v686_v4, 0 }
 0x319   : > { %v474_v10 = vmul.f32 %v473_v7, %v471_v6 }
 0x31b   : > { %v475_v14 = vmul.f32 %v474_v10, %v345_v8  ;;  %v476_v13 = vmul.f32 %v474_v10, %v365_v9 }
 0x31d   : > { %v477_v16 = vrot.slane %v475_v14, 4  ;;  %v483_v12 = vrot.slane %v476_v13, 4 }
 0x31f   : > { %v478_v17 = vadd.f32 %v477_v16, %v475_v14  ;;  %v484_v15 = vadd.f32 %v483_v12, %v476_v13 }
 0x321   : > { %v479_v18 = vrot.slane %v478_v17, 2  ;;  %v485_v19 = vrot.slane %v484_v15, 2 }
 0x323   : > { %v480_v20 = vadd.f32 %v479_v18, %v478_v17  ;;  %v486_v21 = vadd.f32 %v485_v19, %v484_v15 }
 0x325   : > { %v481_v22 = vrot.slane %v480_v20, 1  ;;  %v487_v23 = vrot.slane %v486_v21, 1 }
 0x327   : > { %v482_v24 = vadd.f32 %v481_v22, %v480_v20  ;;  %v488_v25 = vadd.f32 %v487_v23, %v486_v21 }
 0x329   : > { %v489_v26 = vmax.f32 %v482_v24, 0.0  ;;  %v490_v27 = vmax.f32 %v488_v25, 0.0 }
 0x32b   : > { %v494_v28 = vmin.f32 %v489_v26, %v490_v27  ;;  %v491_v29 = vmax.f32 %v489_v26, %v490_v27 }
 0x32d   : > { %495 = vmin.xlane.f32.xlu0 %v494_v28  ;;  %492 = vmax.xlane.f32.xlu2 %v491_v29 }
 0x32e   : > { %728 = shalt.err (!%p725_p4)
}
 0x32f   : > { %643 = dma.vmem_to_hbm [thread:$0]  (%p854_p5), %s538_s22, 16, %s540_s23, %s524_s27   ;;  %vm516_vm11 = vcmp.lt.s32.totalorder %v415_v11, 256 }
 0x330   : > { %s632_s0 = sshll.u32 %s875_s26, 1 }
 0x331   : > { %s306_s18 = scalar_lea.vmem %s1016_s7, %s632_s0 }
 0x3a0   : > { %v496_v30 = vpop.xlane.xlu0 %495  ;;  %v493_v31 = vpop.xlane.xlu2 %492 }
 0x3a1   : > { %v497_v32 = vsub.f32 %v493_v31, %v496_v30  ;;  %v501_v34 = vsub.f32 %v489_v26, %v496_v30  ;;  %v502_v35 = vsub.f32 %v490_v27, %v496_v30 }
 0x3a3   : > { %vm498_vm10 = vcmp.ne.f32.partialorder %v497_v32, 0.0 }
 0x3a4   : > { %v499_v33 = vsel %vm498_vm10, %v497_v32, 1.0 }
 0x3a5   : > { %687 = vrcp.f32 %v499_v33 }
 0x3ab   : > { %v688_v36 = vpop.eup %687 }
 0x3ac   : > { %v503_v37 = vmul.f32 %v688_v36, %v501_v34  ;;  %v504_v38 = vmul.f32 %v688_v36, %v502_v35 }
 0x3ae   : > { %v508_v39 = vsel %vm498_vm10, %v504_v38, %v490_v27  ;;  %v507_v41 = vsel %vm498_vm10, %v503_v37, %v489_v26 }
 0x3af   : > { %v511_v40 = vrot.slane %v508_v39, 7 }
 0x3b1   : > { %v512_v42 = vsel %vm419_vm2, %v507_v41, %v511_v40 }
 0x3b2   : > { %518 = vst.msk [vmem:[%s306_s18] sm:$0x3] %vm516_vm11, %v512_v42 }
 0x3b3 PF: > { %p649_p5 = scmp.ge.s32.totalorder %s765_s12, 2  ;;  %s558_s26 = sand.u32 1, %s753_s9  }
 0x3b4   : > { %s559_s25 = scalar_lea.sflag [#allocation5], %s558_s26 }
 0x3b5   : > { %p646_p7 = pnand %p649_p5, %p858_p6 }
 0x3b7   : > { %p647_p8 = pneg %p646_p7 }
 0x3b9   : > { %748 = dma.done.wait (%p647_p8), %s559_s25, 16  }
 0x3ba   : > { %750 = vsyncadd (%p647_p8), %s559_s25, 4294967280  ;;  %p27_p9 = scmp.ge.s32.totalorder %s841_s14, 4   ;;  %s1022_s9 = smov %s757_s10 }
 0x3bb   : > { %s1023_s10 = smov %s761_s11  ;;  %s1024_s11 = smov %s852_s17 }
 0x3bc   : > { %s1025_s12 = smov %s841_s14  ;;  %29 = sbr.rel (!%p27_p9) target bundleno = 9 (0x9), region = 94 }
 0x3c1   :  { %564 = vsyncpa [#allocation5], 1 }
 0x3c2   :  { %566 = vsyncpa [#allocation5 + $0x1], 1 }

</bundles_post_ra>
